<compile_context>
chip_gen: v7x
topology: tpu7x:2x2x1
jax: 0.10.0
libtpu: 0.0.40
codegen_flags: <defaults>
</compile_context>

<pallas_src>
import functools
import math

import jax
import jax.numpy as jnp
from jax import lax
from jax.experimental import pallas as pl
from jax.experimental.pallas import tpu as pltpu

_EPS = 1e-8


def _round_up(x, m):
    return ((x + m - 1) // m) * m


def _vmem_capacity_bytes():
    """Per-core VMEM capacity; conservative fallback = v7x's 64 MiB per TC."""
    try:
        info = pltpu.get_tpu_info()
        for attr in ("vmem_capacity_bytes", "vmem_capacity"):
            cap = getattr(info, attr, None)
            if cap:
                return int(cap)
    except Exception:
        pass
    return 64 * 1024 * 1024


def _pick_tile(n, d, k, stream_bytes, tile_d):
    """Largest 128-multiple feature tile that fits the VMEM budget."""
    d128 = _round_up(d, 128)
    if tile_d is not None:
        return max(128, min(_round_up(tile_d, 128), d128))
    cap = _vmem_capacity_bytes()
    budget = int(cap * 0.70)                      # headroom for compiler scratch
    kp8 = _round_up(k, 8)
    n128 = _round_up(n, 128)
    fixed = (_round_up(k, 16) * n128 * stream_bytes      # one-hot^T scratch
             + 8 * 128 * 4                                # 1/counts scratch
             + 2 * 8 * n128 * 4                           # labels block (2 bufs)
             + 2 * 3 * kp8 * _round_up(k, 128) * 4        # gA/gB/gAB out blocks
             + 2 * 3 * kp8 * 128 * 4)                     # r/q/sd2 out blocks
    # per feature column: double-buffered E+EF streams, masked copies, f32 centroids
    per_col = 4 * n * stream_bytes + 2 * n * stream_bytes + 2 * kp8 * 4
    tile = max(128, (((budget - fixed) // max(per_col, 1)) // 128) * 128)
    tile = min(tile, d128)
    # prefer >= 2 chunks so the leading "parallel" grid axis can use both v7x
    # TensorCores; costs nothing on single-core chips.
    if tile >= d128 and d128 >= 256:
        tile = _round_up(pl.cdiv(d128, 2), 128)
    return tile


def slol_stats_kernel(lab_ref, e_ref, ef_ref,
                      ga_ref, gb_ref, gab_ref, r_ref, q_ref, sd2_ref,
                      ht_ref, icnt_ref, *, true_d, tile, chunks_per_core):
    """Accumulate per-core statistics over streamed feature chunks.

      gA  = C  C^T,  gB = Cf Cf^T,  gAB = C Cf^T          (K, K)
      r_k = sum_j C[k, j]                                  (K, 1)
      q_k = sum_j sq_j C[k, j],  sq_j = sum_k C[k, j]^2    (K, 1)
      sd2 = sum_j sq_j^2                                   (1, 1)
    """
    c = pl.program_id(0)   # core-split index (parallel)
    i = pl.program_id(1)   # chunk index within this core (reduction)
    k, n = ht_ref.shape

    # -- per-core init: one-hot^T, 1/counts, zero this core's accumulators ----
    @pl.when(i == 0)
    def _init():
        lab = lab_ref[...]                                   # (1, N) int32
        cls = lax.broadcasted_iota(jnp.int32, (k, n), 0)     # (K, N)
        onehot = (cls == lab).astype(jnp.float32)
        ht_ref[...] = onehot.astype(ht_ref.dtype)
        counts = jnp.sum(onehot, axis=1, keepdims=True)      # exact f32 counts
        # NOTE: a class with zero samples gives 1/0 = inf (torch.unique would
        # skip it); every class in [0, num_classes) must be present.
        icnt_ref[...] = pl.reciprocal(counts, approx=False)
        ga_ref[...] = jnp.zeros_like(ga_ref)
        gb_ref[...] = jnp.zeros_like(gb_ref)
        gab_ref[...] = jnp.zeros_like(gab_ref)
        r_ref[...] = jnp.zeros_like(r_ref)
        q_ref[...] = jnp.zeros_like(q_ref)
        sd2_ref[...] = jnp.zeros_like(sd2_ref)

    # -- mask columns beyond the true feature dim: handles the unpadded tail
    #    chunk and any fully out-of-range (clamped) chunk slot ----------------
    global_chunk = c * chunks_per_core + i
    valid = true_d - global_chunk * tile                     # may be <= 0
    col = lax.broadcasted_iota(jnp.int32, e_ref.shape, 1)
    keep = col < valid
    e_raw = e_ref[...]
    ef_raw = ef_ref[...]
    e = jnp.where(keep, e_raw, jnp.zeros_like(e_raw))
    ef = jnp.where(keep, ef_raw, jnp.zeros_like(ef_raw))

    ht = ht_ref[...]                                         # (K, N) stream dtype
    icnt = icnt_ref[...]                                     # (K, 1) f32

    # per-class centroids for this chunk (MXU, f32 accumulation)
    cent = jnp.dot(ht, e, preferred_element_type=jnp.float32) * icnt      # (K, t)
    cent_f = jnp.dot(ht, ef, preferred_element_type=jnp.float32) * icnt   # (K, t)

    def gram(a, b):  # a @ b.T without materializing a transpose
        return lax.dot_general(a, b, (((1,), (1,)), ((), ())),
                               preferred_element_type=jnp.float32)

    ga_ref[...] += gram(cent, cent)
    gb_ref[...] += gram(cent_f, cent_f)
    gab_ref[...] += gram(cent, cent_f)

    sq = jnp.sum(cent * cent, axis=0, keepdims=True)              # (1, t)
    r_ref[...] += jnp.sum(cent, axis=1, keepdims=True)            # (K, 1)
    q_ref[...] += jnp.sum(cent * sq, axis=1, keepdims=True)       # (K, 1)
    sd2_ref[...] += jnp.sum(sq * sq, keepdims=True)               # (1, 1)


def _finalize(ga, gb, gab, r, q, sd2, *, true_d, k):
    """Tiny O(K^2) combine of per-core partial statistics (plain JAX)."""
    ga = jnp.sum(ga, axis=0)
    gb = jnp.sum(gb, axis=0)
    gab = jnp.sum(gab, axis=0)
    r = jnp.sum(r, axis=0)            # (K, 1)
    q = jnp.sum(q, axis=0)            # (K, 1)
    sd2 = jnp.sum(sd2)                # scalar
    kk = float(k * k)

    # latent orthogonality: sum_ij (cov_ij - cov_jj)^2, cov = C^T C / K
    # TODO(synk): difference of near-equal terms can lose precision if the
    #             off-diagonal covariance energy is tiny; fall back to an
    #             explicit per-chunk (cov_ij - d_j)^2 sweep if needed.
    frob_cov = jnp.sum(ga * ga)                 # ||C C^T||_F^2 == ||C^T C||_F^2
    rq = jnp.sum(r * q)
    orth_sq = (frob_cov - 2.0 * rq + true_d * sd2) / kk
    loss_orth = jnp.sqrt(jnp.maximum(orth_sq, 0.0))

    # pairwise centroid-difference cosine similarity from Gram matrices
    dA = jnp.diagonal(ga)[:, None]
    dB = jnp.diagonal(gb)[:, None]
    dAB = jnp.diagonal(gab)[:, None]
    num = dAB + dAB.T - gab - gab.T                    # <c_i-c_j, cf_i-cf_j>
    na2 = jnp.maximum(dA + dA.T - 2.0 * ga, 0.0)       # ||c_i - c_j||^2
    nb2 = jnp.maximum(dB + dB.T - 2.0 * gb, 0.0)       # ||cf_i - cf_j||^2
    cos = num * lax.rsqrt(jnp.maximum(na2 * nb2, _EPS * _EPS))
    loss_cos = jnp.sum(cos * (1.0 - jnp.eye(k, dtype=cos.dtype))) / 2.0
    return loss_orth + loss_cos


def slol_loss(embeddings, embeddings_frozen, labels, num_classes, *,
              tile_d=None, stream_dtype=jnp.bfloat16):
    """SLOL forward. embeddings/embeddings_frozen: (N, ...); labels: (N,)."""
    n = embeddings.shape[0]
    d = int(math.prod(embeddings.shape[1:]))
    k = int(num_classes)

    E = embeddings.reshape(n, d)
    EF = embeddings_frozen.reshape(n, d)
    # cast only when needed (avoid an extra full HBM round trip); bf16 stream,
    # f32 accumulation in-kernel.
    if E.dtype != stream_dtype:
        E = E.astype(stream_dtype)
    if EF.dtype != stream_dtype:
        EF = EF.astype(stream_dtype)
    lab = labels.reshape(1, n)
    if lab.dtype != jnp.int32:
        lab = lab.astype(jnp.int32)

    stream_bytes = jnp.dtype(stream_dtype).itemsize
    tile = _pick_tile(n, d, k, stream_bytes, tile_d)
    num_chunks = pl.cdiv(d, tile)
    n_split = 2 if num_chunks >= 2 else 1      # feeds both TensorCores on v7x
    cpc = pl.cdiv(num_chunks, n_split)         # chunks per core

    if n_split * cpc == num_chunks:
        def chunk_map(c, i):
            return (0, c * cpc + i)
    else:
        # odd chunk count: clamp the over-run slot; its columns are fully
        # masked in-kernel so it contributes nothing.
        def chunk_map(c, i):
            return (0, jnp.minimum(c * cpc + i, num_chunks - 1))

    kernel = functools.partial(slol_stats_kernel, true_d=d, tile=tile,
                               chunks_per_core=cpc)

    def acc_spec(shape):
        return pl.BlockSpec(shape, lambda c, i: (c, 0, 0))

    out_shapes = (
        jax.ShapeDtypeStruct((n_split, k, k), jnp.float32),   # gA  = C  C^T
        jax.ShapeDtypeStruct((n_split, k, k), jnp.float32),   # gB  = Cf Cf^T
        jax.ShapeDtypeStruct((n_split, k, k), jnp.float32),   # gAB = C  Cf^T
        jax.ShapeDtypeStruct((n_split, k, 1), jnp.float32),   # r
        jax.ShapeDtypeStruct((n_split, k, 1), jnp.float32),   # q
        jax.ShapeDtypeStruct((n_split, 1, 1), jnp.float32),   # sum_j sq_j^2
    )
    out_specs = (
        acc_spec((None, k, k)), acc_spec((None, k, k)), acc_spec((None, k, k)),
        acc_spec((None, k, 1)), acc_spec((None, k, 1)), acc_spec((None, 1, 1)),
    )

    vmem_cap = _vmem_capacity_bytes()
    vmem_limit = max(32 * 1024 * 1024,
                     min(int(vmem_cap * 0.8), 100 * 1024 * 1024))

    ga, gb, gab, r, q, sd2 = pl.pallas_call(
        kernel,
        out_shape=out_shapes,
        grid_spec=pltpu.PrefetchScalarGridSpec(
            num_scalar_prefetch=0,
            grid=(n_split, cpc),
            in_specs=[
                pl.BlockSpec((1, n), lambda c, i: (0, 0)),    # labels (resident)
                pl.BlockSpec((n, tile), chunk_map),           # E chunk
                pl.BlockSpec((n, tile), chunk_map),           # EF chunk
                # TODO(synk): if profiling shows exposed DMA gaps, try
                # pipeline_mode=pl.Buffered(3) on the E/EF specs.
            ],
            out_specs=out_specs,
            scratch_shapes=[
                pltpu.VMEM((k, n), stream_dtype),    # one-hot^T cache
                pltpu.VMEM((k, 1), jnp.float32),     # 1 / class counts
            ],
        ),
        compiler_params=pltpu.CompilerParams(
            dimension_semantics=("parallel", "arbitrary"),
            vmem_limit_bytes=vmem_limit,
        ),
    )(lab, E, EF)

    return _finalize(ga, gb, gab, r, q, sd2, true_d=float(d), k=k)


def slol_loss_ref(embeddings, embeddings_frozen, labels, num_classes):
    """Pure-JAX reference mirroring the PyTorch forward literally (f32)."""
    n = embeddings.shape[0]
    E = embeddings.reshape(n, -1).astype(jnp.float32)
    EF = embeddings_frozen.reshape(n, -1).astype(jnp.float32)
    cents, cents_f = [], []
    for i in range(num_classes):
        m = (labels == i).astype(jnp.float32)[:, None]
        cnt = jnp.sum(m)
        cents.append(jnp.sum(E * m, axis=0) / cnt)
        cents_f.append(jnp.sum(EF * m, axis=0) / cnt)
    cent = jnp.stack(cents)       # (K, D)
    cent_f = jnp.stack(cents_f)   # (K, D)
    K = cent.shape[0]

    cov = (cent.T @ cent) / K
    off = cov - jnp.diagonal(cov)[None, :]
    loss = jnp.sqrt(jnp.sum(off * off))

    diff = cent[:, None, :] - cent[None, :, :]
    diff_f = cent_f[:, None, :] - cent_f[None, :, :]
    w12 = jnp.sum(diff * diff_f, axis=-1)
    w1 = jnp.sum(diff * diff, axis=-1)
    w2 = jnp.sum(diff_f * diff_f, axis=-1)
    cos = w12 / jnp.sqrt(jnp.maximum(w1 * w2, _EPS * _EPS))
    loss = loss + jnp.sum(cos * (1.0 - jnp.eye(K))) / 2.0
    return loss


if __name__ == "__main__":
    key = jax.random.PRNGKey(0)
    k1, k2 = jax.random.split(key)

    # D = 4*16*15 = 960 is deliberately NOT a multiple of 128, so the in-kernel
    # tail mask is exercised (no host-side padding is performed).
    N, C, H, W = 8, 4, 16, 15
    NUM_CLASSES = 4
    embeddings = jax.random.normal(k1, (N, C, H, W), dtype=jnp.float32)
    embeddings_frozen = jax.random.normal(k2, (N, C, H, W), dtype=jnp.float32)
    labels = jnp.array([0, 1, 2, 3, 0, 1, 2, 3], dtype=jnp.int32)

    ref = slol_loss_ref(embeddings, embeddings_frozen, labels, NUM_CLASSES)

    # 1) even chunk count (4 chunks -> 2 per core-split), partial tail chunk
    out = jax.block_until_ready(
        slol_loss(embeddings, embeddings_frozen, labels, NUM_CLASSES, tile_d=256))
    assert jnp.allclose(out, ref, rtol=2e-2, atol=1e-2), (out, ref)

    # 2) odd chunk count (3 chunks) -> clamped + fully masked trailing slot
    out = jax.block_until_ready(
        slol_loss(embeddings, embeddings_frozen, labels, NUM_CLASSES, tile_d=384))
    assert jnp.allclose(out, ref, rtol=2e-2, atol=1e-2), (out, ref)

    # 3) auto-sized tile (VMEM-budget path), bf16 streaming
    out = jax.block_until_ready(
        slol_loss(embeddings, embeddings_frozen, labels, NUM_CLASSES))
    assert jnp.allclose(out, ref, rtol=2e-2, atol=1e-2), (out, ref)

    print("KERNEL_OK")
</pallas_src>

<mosaic_0001>
module attributes {stable_mosaic.version = 11 : i64} {
  func.func @slol_stats_kernel(%arg0: i32, %arg1: i32, %arg2: memref<1x8xi32, #tpu.memory_space<vmem>>, %arg3: memref<8x256xbf16, #tpu.memory_space<vmem>>, %arg4: memref<8x256xbf16, #tpu.memory_space<vmem>>, %arg5: memref<1x4x4xf32, #tpu.memory_space<vmem>>, %arg6: memref<1x4x4xf32, #tpu.memory_space<vmem>>, %arg7: memref<1x4x4xf32, #tpu.memory_space<vmem>>, %arg8: memref<1x4x1xf32, #tpu.memory_space<vmem>>, %arg9: memref<1x4x1xf32, #tpu.memory_space<vmem>>, %arg10: memref<1x1x1xf32, #tpu.memory_space<vmem>>, %arg11: memref<4x8xbf16, #tpu.memory_space<vmem>>, %arg12: memref<4x1xf32, #tpu.memory_space<vmem>>) attributes {dimension_semantics = [#tpu.dimension_semantics<parallel>, #tpu.dimension_semantics<arbitrary>], iteration_bounds = array<i64: 2, 2>, scalar_prefetch = 0 : i64, scratch_operands = 2 : i64, tpu.core_type = #tpu.core_type<tc>, window_params = [{pipeline_mode = #tpu.pipeline_mode<synchronous>, transform_indices = @transform_0, window_bounds = array<i64: 1, 8>}, {transform_indices = @transform_1, window_bounds = array<i64: 8, 256>}, {transform_indices = @transform_2, window_bounds = array<i64: 8, 256>}, {transform_indices = @transform_3, window_bounds = array<i64: 1, 4, 4>}, {transform_indices = @transform_4, window_bounds = array<i64: 1, 4, 4>}, {transform_indices = @transform_5, window_bounds = array<i64: 1, 4, 4>}, {transform_indices = @transform_6, window_bounds = array<i64: 1, 4, 1>}, {transform_indices = @transform_7, window_bounds = array<i64: 1, 4, 1>}, {transform_indices = @transform_8, window_bounds = array<i64: 1, 1, 1>}]} {
    %c0_i32 = arith.constant 0 : i32
    %0 = arith.cmpi eq, %arg1, %c0_i32 : i32
    %1 = arith.extui %0 : i1 to i32
    %c0_i32_0 = arith.constant 0 : i32
    %2 = arith.cmpi ne, %1, %c0_i32_0 : i32
    scf.if %2 {
      %c0_54 = arith.constant 0 : index
      %c0_55 = arith.constant 0 : index
      %78 = vector.load %arg2[%c0_54, %c0_55] : memref<1x8xi32, #tpu.memory_space<vmem>>, vector<1x8xi32>
      %79 = tpu.iota {dimensions = array<i32: 0>} : vector<4x8xi32>
      %80 = vector.broadcast %78 : vector<1x8xi32> to vector<4x8xi32>
      %81 = arith.cmpi eq, %79, %80 : vector<4x8xi32>
      %82 = arith.extui %81 : vector<4x8xi1> to vector<4x8xi32>
      %83 = arith.sitofp %82 : vector<4x8xi32> to vector<4x8xf32>
      %84 = arith.truncf %83 : vector<4x8xf32> to vector<4x8xbf16>
      %c0_56 = arith.constant 0 : index
      %c0_57 = arith.constant 0 : index
      %85 = vector.load %arg11[%c0_56, %c0_57] : memref<4x8xbf16, #tpu.memory_space<vmem>>, vector<4x8xbf16>
      tpu.vector_store %arg11[%c0_56, %c0_57], %84 {strides = array<i32>} : memref<4x8xbf16, #tpu.memory_space<vmem>>, vector<4x8xbf16>,
      %cst_58 = arith.constant dense<0.000000e+00> : vector<4xf32>
      %86 = vector.multi_reduction <add>, %83, %cst_58 [1] : vector<4x8xf32> to vector<4xf32>
      %87 = vector.shape_cast %86 : vector<4xf32> to vector<4x1xf32>
      %88 = tpu.reciprocal %87 : vector<4x1xf32> -> vector<4x1xf32>
      %c0_59 = arith.constant 0 : index
      %c0_60 = arith.constant 0 : index
      %89 = vector.load %arg12[%c0_59, %c0_60] : memref<4x1xf32, #tpu.memory_space<vmem>>, vector<4x1xf32>
      tpu.vector_store %arg12[%c0_59, %c0_60], %88 {strides = array<i32>} : memref<4x1xf32, #tpu.memory_space<vmem>>, vector<4x1xf32>,
      %cst_61 = arith.constant 0.000000e+00 : f32
      %90 = vector.broadcast %cst_61 : f32 to vector<4x4xf32>
      %c0_62 = arith.constant 0 : index
      %c0_63 = arith.constant 0 : index
      %c0_64 = arith.constant 0 : index
      %91 = vector.load %arg5[%c0_62, %c0_63, %c0_64] : memref<1x4x4xf32, #tpu.memory_space<vmem>>, vector<1x4x4xf32>
      %92 = vector.shape_cast %91 : vector<1x4x4xf32> to vector<4x4xf32>
      %93 = vector.shape_cast %90 : vector<4x4xf32> to vector<1x4x4xf32>
      tpu.vector_store %arg5[%c0_62, %c0_63, %c0_64], %93 {strides = array<i32>} : memref<1x4x4xf32, #tpu.memory_space<vmem>>, vector<1x4x4xf32>,
      %cst_65 = arith.constant 0.000000e+00 : f32
      %94 = vector.broadcast %cst_65 : f32 to vector<4x4xf32>
      %c0_66 = arith.constant 0 : index
      %c0_67 = arith.constant 0 : index
      %c0_68 = arith.constant 0 : index
      %95 = vector.load %arg6[%c0_66, %c0_67, %c0_68] : memref<1x4x4xf32, #tpu.memory_space<vmem>>, vector<1x4x4xf32>
      %96 = vector.shape_cast %95 : vector<1x4x4xf32> to vector<4x4xf32>
      %97 = vector.shape_cast %94 : vector<4x4xf32> to vector<1x4x4xf32>
      tpu.vector_store %arg6[%c0_66, %c0_67, %c0_68], %97 {strides = array<i32>} : memref<1x4x4xf32, #tpu.memory_space<vmem>>, vector<1x4x4xf32>,
      %cst_69 = arith.constant 0.000000e+00 : f32
      %98 = vector.broadcast %cst_69 : f32 to vector<4x4xf32>
      %c0_70 = arith.constant 0 : index
      %c0_71 = arith.constant 0 : index
      %c0_72 = arith.constant 0 : index
      %99 = vector.load %arg7[%c0_70, %c0_71, %c0_72] : memref<1x4x4xf32, #tpu.memory_space<vmem>>, vector<1x4x4xf32>
      %100 = vector.shape_cast %99 : vector<1x4x4xf32> to vector<4x4xf32>
      %101 = vector.shape_cast %98 : vector<4x4xf32> to vector<1x4x4xf32>
      tpu.vector_store %arg7[%c0_70, %c0_71, %c0_72], %101 {strides = array<i32>} : memref<1x4x4xf32, #tpu.memory_space<vmem>>, vector<1x4x4xf32>,
      %cst_73 = arith.constant 0.000000e+00 : f32
      %102 = vector.broadcast %cst_73 : f32 to vector<4x1xf32>
      %c0_74 = arith.constant 0 : index
      %c0_75 = arith.constant 0 : index
      %c0_76 = arith.constant 0 : index
      %103 = vector.load %arg8[%c0_74, %c0_75, %c0_76] : memref<1x4x1xf32, #tpu.memory_space<vmem>>, vector<1x4x1xf32>
      %104 = vector.shape_cast %103 : vector<1x4x1xf32> to vector<4x1xf32>
      %105 = vector.shape_cast %102 : vector<4x1xf32> to vector<1x4x1xf32>
      tpu.vector_store %arg8[%c0_74, %c0_75, %c0_76], %105 {strides = array<i32>} : memref<1x4x1xf32, #tpu.memory_space<vmem>>, vector<1x4x1xf32>,
      %cst_77 = arith.constant 0.000000e+00 : f32
      %106 = vector.broadcast %cst_77 : f32 to vector<4x1xf32>
      %c0_78 = arith.constant 0 : index
      %c0_79 = arith.constant 0 : index
      %c0_80 = arith.constant 0 : index
      %107 = vector.load %arg9[%c0_78, %c0_79, %c0_80] : memref<1x4x1xf32, #tpu.memory_space<vmem>>, vector<1x4x1xf32>
      %108 = vector.shape_cast %107 : vector<1x4x1xf32> to vector<4x1xf32>
      %109 = vector.shape_cast %106 : vector<4x1xf32> to vector<1x4x1xf32>
      tpu.vector_store %arg9[%c0_78, %c0_79, %c0_80], %109 {strides = array<i32>} : memref<1x4x1xf32, #tpu.memory_space<vmem>>, vector<1x4x1xf32>,
      %cst_81 = arith.constant 0.000000e+00 : f32
      %110 = vector.broadcast %cst_81 : f32 to vector<1x1xf32>
      %c0_82 = arith.constant 0 : index
      %c0_83 = arith.constant 0 : index
      %c0_84 = arith.constant 0 : index
      %111 = vector.load %arg10[%c0_82, %c0_83, %c0_84] : memref<1x1x1xf32, #tpu.memory_space<vmem>>, vector<1x1x1xf32>
      %112 = vector.shape_cast %111 : vector<1x1x1xf32> to vector<1x1xf32>
      %113 = vector.shape_cast %110 : vector<1x1xf32> to vector<1x1x1xf32>
      tpu.vector_store %arg10[%c0_82, %c0_83, %c0_84], %113 {strides = array<i32>} : memref<1x1x1xf32, #tpu.memory_space<vmem>>, vector<1x1x1xf32>,
    } else {
    }
    %c2_i32 = arith.constant 2 : i32
    %3 = arith.muli %arg0, %c2_i32 : i32
    %4 = arith.addi %3, %arg1 : i32
    %c256_i32 = arith.constant 256 : i32
    %5 = arith.muli %4, %c256_i32 : i32
    %c960_i32 = arith.constant 960 : i32
    %6 = arith.subi %c960_i32, %5 : i32
    %7 = tpu.iota {dimensions = array<i32: 1>} : vector<8x256xi32>
    %8 = vector.broadcast %6 : i32 to vector<8x256xi32>
    %9 = arith.cmpi slt, %7, %8 : vector<8x256xi32>
    %c0 = arith.constant 0 : index
    %c0_1 = arith.constant 0 : index
    %10 = vector.load %arg3[%c0, %c0_1] : memref<8x256xbf16, #tpu.memory_space<vmem>>, vector<8x256xbf16>
    %c0_2 = arith.constant 0 : index
    %c0_3 = arith.constant 0 : index
    %11 = vector.load %arg4[%c0_2, %c0_3] : memref<8x256xbf16, #tpu.memory_space<vmem>>, vector<8x256xbf16>
    %cst = arith.constant 0.000000e+00 : bf16
    %12 = vector.broadcast %cst : bf16 to vector<8x256xbf16>
    %13 = arith.select %9, %10, %12 : vector<8x256xi1>, vector<8x256xbf16>
    %cst_4 = arith.constant 0.000000e+00 : bf16
    %14 = vector.broadcast %cst_4 : bf16 to vector<8x256xbf16>
    %15 = arith.select %9, %11, %14 : vector<8x256xi1>, vector<8x256xbf16>
    %c0_5 = arith.constant 0 : index
    %c0_6 = arith.constant 0 : index
    %16 = vector.load %arg11[%c0_5, %c0_6] : memref<4x8xbf16, #tpu.memory_space<vmem>>, vector<4x8xbf16>
    %c0_7 = arith.constant 0 : index
    %c0_8 = arith.constant 0 : index
    %17 = vector.load %arg12[%c0_7, %c0_8] : memref<4x1xf32, #tpu.memory_space<vmem>>, vector<4x1xf32>
    %cst_9 = arith.constant dense<0.000000e+00> : vector<4x256xf32>
    %18 = tpu.matmul %16, %13, %cst_9 {dimension_numbers = #tpu.dot_dimension_numbers<[1], [0], [0], [1], [0, 0, 1, 1], [], []>} : vector<4x8xbf16>, vector<8x256xbf16>, vector<4x256xf32> -> vector<4x256xf32>
    %19 = vector.broadcast %17 : vector<4x1xf32> to vector<4x256xf32>
    %20 = arith.mulf %18, %19 : vector<4x256xf32>
    %cst_10 = arith.constant dense<0.000000e+00> : vector<4x256xf32>
    %21 = tpu.matmul %16, %15, %cst_10 {dimension_numbers = #tpu.dot_dimension_numbers<[1], [0], [0], [1], [0, 0, 1, 1], [], []>} : vector<4x8xbf16>, vector<8x256xbf16>, vector<4x256xf32> -> vector<4x256xf32>
    %22 = vector.broadcast %17 : vector<4x1xf32> to vector<4x256xf32>
    %23 = arith.mulf %21, %22 : vector<4x256xf32>
    %c0_11 = arith.constant 0 : index
    %c0_12 = arith.constant 0 : index
    %c0_13 = arith.constant 0 : index
    %24 = vector.load %arg5[%c0_11, %c0_12, %c0_13] : memref<1x4x4xf32, #tpu.memory_space<vmem>>, vector<1x4x4xf32>
    %25 = vector.shape_cast %24 : vector<1x4x4xf32> to vector<4x4xf32>
    %cst_14 = arith.constant dense<0.000000e+00> : vector<4x4xf32>
    %26 = tpu.matmul %20, %20, %cst_14 {dimension_numbers = #tpu.dot_dimension_numbers<[1], [1], [0], [0], [0, 0, 1, 0], [], []>} : vector<4x256xf32>, vector<4x256xf32>, vector<4x4xf32> -> vector<4x4xf32>
    %27 = arith.addf %25, %26 : vector<4x4xf32>
    %c0_15 = arith.constant 0 : index
    %c0_16 = arith.constant 0 : index
    %c0_17 = arith.constant 0 : index
    %28 = vector.load %arg5[%c0_15, %c0_16, %c0_17] : memref<1x4x4xf32, #tpu.memory_space<vmem>>, vector<1x4x4xf32>
    %29 = vector.shape_cast %28 : vector<1x4x4xf32> to vector<4x4xf32>
    %30 = vector.shape_cast %27 : vector<4x4xf32> to vector<1x4x4xf32>
    tpu.vector_store %arg5[%c0_15, %c0_16, %c0_17], %30 {strides = array<i32>} : memref<1x4x4xf32, #tpu.memory_space<vmem>>, vector<1x4x4xf32>,
    %c0_18 = arith.constant 0 : index
    %c0_19 = arith.constant 0 : index
    %c0_20 = arith.constant 0 : index
    %31 = vector.load %arg6[%c0_18, %c0_19, %c0_20] : memref<1x4x4xf32, #tpu.memory_space<vmem>>, vector<1x4x4xf32>
    %32 = vector.shape_cast %31 : vector<1x4x4xf32> to vector<4x4xf32>
    %cst_21 = arith.constant dense<0.000000e+00> : vector<4x4xf32>
    %33 = tpu.matmul %23, %23, %cst_21 {dimension_numbers = #tpu.dot_dimension_numbers<[1], [1], [0], [0], [0, 0, 1, 0], [], []>} : vector<4x256xf32>, vector<4x256xf32>, vector<4x4xf32> -> vector<4x4xf32>
    %34 = arith.addf %32, %33 : vector<4x4xf32>
    %c0_22 = arith.constant 0 : index
    %c0_23 = arith.constant 0 : index
    %c0_24 = arith.constant 0 : index
    %35 = vector.load %arg6[%c0_22, %c0_23, %c0_24] : memref<1x4x4xf32, #tpu.memory_space<vmem>>, vector<1x4x4xf32>
    %36 = vector.shape_cast %35 : vector<1x4x4xf32> to vector<4x4xf32>
    %37 = vector.shape_cast %34 : vector<4x4xf32> to vector<1x4x4xf32>
    tpu.vector_store %arg6[%c0_22, %c0_23, %c0_24], %37 {strides = array<i32>} : memref<1x4x4xf32, #tpu.memory_space<vmem>>, vector<1x4x4xf32>,
    %c0_25 = arith.constant 0 : index
    %c0_26 = arith.constant 0 : index
    %c0_27 = arith.constant 0 : index
    %38 = vector.load %arg7[%c0_25, %c0_26, %c0_27] : memref<1x4x4xf32, #tpu.memory_space<vmem>>, vector<1x4x4xf32>
    %39 = vector.shape_cast %38 : vector<1x4x4xf32> to vector<4x4xf32>
    %cst_28 = arith.constant dense<0.000000e+00> : vector<4x4xf32>
    %40 = tpu.matmul %20, %23, %cst_28 {dimension_numbers = #tpu.dot_dimension_numbers<[1], [1], [0], [0], [0, 0, 1, 0], [], []>} : vector<4x256xf32>, vector<4x256xf32>, vector<4x4xf32> -> vector<4x4xf32>
    %41 = arith.addf %39, %40 : vector<4x4xf32>
    %c0_29 = arith.constant 0 : index
    %c0_30 = arith.constant 0 : index
    %c0_31 = arith.constant 0 : index
    %42 = vector.load %arg7[%c0_29, %c0_30, %c0_31] : memref<1x4x4xf32, #tpu.memory_space<vmem>>, vector<1x4x4xf32>
    %43 = vector.shape_cast %42 : vector<1x4x4xf32> to vector<4x4xf32>
    %44 = vector.shape_cast %41 : vector<4x4xf32> to vector<1x4x4xf32>
    tpu.vector_store %arg7[%c0_29, %c0_30, %c0_31], %44 {strides = array<i32>} : memref<1x4x4xf32, #tpu.memory_space<vmem>>, vector<1x4x4xf32>,
    %45 = arith.mulf %20, %20 : vector<4x256xf32>
    %cst_32 = arith.constant dense<0.000000e+00> : vector<256xf32>
    %46 = vector.multi_reduction <add>, %45, %cst_32 [0] : vector<4x256xf32> to vector<256xf32>
    %47 = vector.shape_cast %46 : vector<256xf32> to vector<1x256xf32>
    %c0_33 = arith.constant 0 : index
    %c0_34 = arith.constant 0 : index
    %c0_35 = arith.constant 0 : index
    %48 = vector.load %arg8[%c0_33, %c0_34, %c0_35] : memref<1x4x1xf32, #tpu.memory_space<vmem>>, vector<1x4x1xf32>
    %49 = vector.shape_cast %48 : vector<1x4x1xf32> to vector<4x1xf32>
    %cst_36 = arith.constant dense<0.000000e+00> : vector<4xf32>
    %50 = vector.multi_reduction <add>, %20, %cst_36 [1] : vector<4x256xf32> to vector<4xf32>
    %51 = vector.shape_cast %50 : vector<4xf32> to vector<4x1xf32>
    %52 = arith.addf %49, %51 : vector<4x1xf32>
    %c0_37 = arith.constant 0 : index
    %c0_38 = arith.constant 0 : index
    %c0_39 = arith.constant 0 : index
    %53 = vector.load %arg8[%c0_37, %c0_38, %c0_39] : memref<1x4x1xf32, #tpu.memory_space<vmem>>, vector<1x4x1xf32>
    %54 = vector.shape_cast %53 : vector<1x4x1xf32> to vector<4x1xf32>
    %55 = vector.shape_cast %52 : vector<4x1xf32> to vector<1x4x1xf32>
    tpu.vector_store %arg8[%c0_37, %c0_38, %c0_39], %55 {strides = array<i32>} : memref<1x4x1xf32, #tpu.memory_space<vmem>>, vector<1x4x1xf32>,
    %c0_40 = arith.constant 0 : index
    %c0_41 = arith.constant 0 : index
    %c0_42 = arith.constant 0 : index
    %56 = vector.load %arg9[%c0_40, %c0_41, %c0_42] : memref<1x4x1xf32, #tpu.memory_space<vmem>>, vector<1x4x1xf32>
    %57 = vector.shape_cast %56 : vector<1x4x1xf32> to vector<4x1xf32>
    %58 = vector.broadcast %47 : vector<1x256xf32> to vector<4x256xf32>
    %59 = arith.mulf %20, %58 : vector<4x256xf32>
    %cst_43 = arith.constant dense<0.000000e+00> : vector<4xf32>
    %60 = vector.multi_reduction <add>, %59, %cst_43 [1] : vector<4x256xf32> to vector<4xf32>
    %61 = vector.shape_cast %60 : vector<4xf32> to vector<4x1xf32>
    %62 = arith.addf %57, %61 : vector<4x1xf32>
    %c0_44 = arith.constant 0 : index
    %c0_45 = arith.constant 0 : index
    %c0_46 = arith.constant 0 : index
    %63 = vector.load %arg9[%c0_44, %c0_45, %c0_46] : memref<1x4x1xf32, #tpu.memory_space<vmem>>, vector<1x4x1xf32>
    %64 = vector.shape_cast %63 : vector<1x4x1xf32> to vector<4x1xf32>
    %65 = vector.shape_cast %62 : vector<4x1xf32> to vector<1x4x1xf32>
    tpu.vector_store %arg9[%c0_44, %c0_45, %c0_46], %65 {strides = array<i32>} : memref<1x4x1xf32, #tpu.memory_space<vmem>>, vector<1x4x1xf32>,
    %c0_47 = arith.constant 0 : index
    %c0_48 = arith.constant 0 : index
    %c0_49 = arith.constant 0 : index
    %66 = vector.load %arg10[%c0_47, %c0_48, %c0_49] : memref<1x1x1xf32, #tpu.memory_space<vmem>>, vector<1x1x1xf32>
    %67 = vector.shape_cast %66 : vector<1x1x1xf32> to vector<1x1xf32>
    %68 = arith.mulf %47, %47 : vector<1x256xf32>
    %69 = vector.shape_cast %68 : vector<1x256xf32> to vector<1x1x256xf32>
    %cst_50 = arith.constant dense<0.000000e+00> : vector<1xf32>
    %70 = vector.multi_reduction <add>, %69, %cst_50 [1, 2] : vector<1x1x256xf32> to vector<1xf32>
    %71 = vector.shape_cast %70 : vector<1xf32> to vector<1x1x1xf32>
    %72 = vector.extract %71[0, 0, 0] : f32 from vector<1x1x1xf32>
    %73 = vector.broadcast %72 : f32 to vector<1x1xf32>
    %74 = arith.addf %67, %73 : vector<1x1xf32>
    %c0_51 = arith.constant 0 : index
    %c0_52 = arith.constant 0 : index
    %c0_53 = arith.constant 0 : index
    %75 = vector.load %arg10[%c0_51, %c0_52, %c0_53] : memref<1x1x1xf32, #tpu.memory_space<vmem>>, vector<1x1x1xf32>
    %76 = vector.shape_cast %75 : vector<1x1x1xf32> to vector<1x1xf32>
    %77 = vector.shape_cast %74 : vector<1x1xf32> to vector<1x1x1xf32>
    tpu.vector_store %arg10[%c0_51, %c0_52, %c0_53], %77 {strides = array<i32>} : memref<1x1x1xf32, #tpu.memory_space<vmem>>, vector<1x1x1xf32>,
    return
  }
  func.func @transform_0(%arg0: i32, %arg1: i32) -> (i32, i32) {
    %c0_i32 = arith.constant 0 : i32
    %c0_i32_0 = arith.constant 0 : i32
    %c0_i32_1 = arith.constant 0 : i32
    return %c0_i32, %c0_i32_0 : i32, i32
  }
  func.func @transform_1(%arg0: i32, %arg1: i32) -> (i32, i32) {
    %c2_i32 = arith.constant 2 : i32
    %0 = arith.muli %arg0, %c2_i32 : i32
    %1 = arith.addi %0, %arg1 : i32
    %c0_i32 = arith.constant 0 : i32
    %c0_i32_0 = arith.constant 0 : i32
    return %c0_i32, %1 : i32, i32
  }
  func.func @transform_2(%arg0: i32, %arg1: i32) -> (i32, i32) {
    %c2_i32 = arith.constant 2 : i32
    %0 = arith.muli %arg0, %c2_i32 : i32
    %1 = arith.addi %0, %arg1 : i32
    %c0_i32 = arith.constant 0 : i32
    %c0_i32_0 = arith.constant 0 : i32
    return %c0_i32, %1 : i32, i32
  }
  func.func @transform_3(%arg0: i32, %arg1: i32) -> (i32, i32, i32) {
    %c0_i32 = arith.constant 0 : i32
    %c0_i32_0 = arith.constant 0 : i32
    %c0_i32_1 = arith.constant 0 : i32
    return %arg0, %c0_i32, %c0_i32_0 : i32, i32, i32
  }
  func.func @transform_4(%arg0: i32, %arg1: i32) -> (i32, i32, i32) {
    %c0_i32 = arith.constant 0 : i32
    %c0_i32_0 = arith.constant 0 : i32
    %c0_i32_1 = arith.constant 0 : i32
    return %arg0, %c0_i32, %c0_i32_0 : i32, i32, i32
  }
  func.func @transform_5(%arg0: i32, %arg1: i32) -> (i32, i32, i32) {
    %c0_i32 = arith.constant 0 : i32
    %c0_i32_0 = arith.constant 0 : i32
    %c0_i32_1 = arith.constant 0 : i32
    return %arg0, %c0_i32, %c0_i32_0 : i32, i32, i32
  }
  func.func @transform_6(%arg0: i32, %arg1: i32) -> (i32, i32, i32) {
    %c0_i32 = arith.constant 0 : i32
    %c0_i32_0 = arith.constant 0 : i32
    %c0_i32_1 = arith.constant 0 : i32
    return %arg0, %c0_i32, %c0_i32_0 : i32, i32, i32
  }
  func.func @transform_7(%arg0: i32, %arg1: i32) -> (i32, i32, i32) {
    %c0_i32 = arith.constant 0 : i32
    %c0_i32_0 = arith.constant 0 : i32
    %c0_i32_1 = arith.constant 0 : i32
    return %arg0, %c0_i32, %c0_i32_0 : i32, i32, i32
  }
  func.func @transform_8(%arg0: i32, %arg1: i32) -> (i32, i32, i32) {
    %c0_i32 = arith.constant 0 : i32
    %c0_i32_0 = arith.constant 0 : i32
    %c0_i32_1 = arith.constant 0 : i32
    return %arg0, %c0_i32, %c0_i32_0 : i32, i32, i32
  }
}

</mosaic_0001>

<bundles_post_ra>
// kernel: tpu_custom_call.1
= control target key start
LH: loop header
LB: loop body
LE: loop exit
PB: predicated region body
PF: predicated region fallthrough
CT: control target
= control target key end

     0   :  { %s2182_s0 = inlined_call_operand.hbm [shape: s32[1,8], index: 0, kind: input, shape index: {}]   ;;  %s2183_s1 = inlined_call_operand.hbm [shape: bf16[8,960], index: 1, kind: input, shape index: {}]   ;;  %s2184_s2 = inlined_call_operand.hbm [shape: bf16[8,960], index: 2, kind: input, shape index: {}]   ;;  %s2185_s3 = inlined_call_operand.hbm [shape: f32[2,4,4], index: 3, kind: output, shape index: {0}]   ;;  %s2186_s4 = inlined_call_operand.hbm [shape: f32[2,4,4], index: 4, kind: output, shape index: {1}]   ;;  %s2187_s5 = inlined_call_operand.hbm [shape: f32[2,4,4], index: 5, kind: output, shape index: {2}]   ;;  %s2188_s6 = inlined_call_operand.vmem [shape: f32[2,4,1], index: 6, kind: output, shape index: {3}]   ;;  %s2189_s7 = inlined_call_operand.vmem [shape: f32[2,4,1], index: 7, kind: output, shape index: {4}]   ;;  %s2190_s8 = inlined_call_operand.vmem [shape: f32[2,1,1], index: 8, kind: output, shape index: {5}]  }
   0x1   :  { %2206 = sst [smem:[#allocation24_spill]] %s2182_s0 }
   0x2   :  { %2207 = sst [smem:[#allocation25_spill]] %s2183_s1 }
   0x3   :  { %2208 = sst [smem:[#allocation26_spill]] %s2184_s2 }
   0x4   :  { %2209 = sst [smem:[#allocation27_spill]] %s2185_s3 }
   0x5   :  { %2210 = sst [smem:[#allocation28_spill]] %s2186_s4 }
   0x6   :  { %2211 = sst [smem:[#allocation29_spill]] %s2187_s5 }
   0x7   :  { %2212 = sst [smem:[#allocation30_spill]] %s2188_s6 }
   0x8   :  { %2213 = sst [smem:[#allocation31_spill]] %s2189_s7 }
   0x9   :  { %14 = vsyncpa [#allocation5], 0 }
   0xa   :  { %15 = vsyncpa [#allocation8], 0 }
   0xb   :  { %17 = vsyncpa [#allocation8 + $0x1], 0 }
   0xc   :  { %18 = vsyncpa [#allocation6], 0 }
   0xd   :  { %20 = vsyncpa [#allocation6 + $0x1], 0 }
   0xe   :  { %21 = vsyncpa [#allocation12], 0 }
   0xf   :  { %23 = vsyncpa [#allocation12 + $0x1], 0  ;;  %s1717_s27 = smov 0   ;;  %s1719_s28 = smov 0  }
  0x10   :  { %s1721_s29 = smov 0   ;;  %s1723_s30 = smov 0  }
  0x11   :  { %s1725_s9 = smov 0   ;;  %s1727_s10 = smov 0  }
  0x12   :  { %s1729_s11 = smov 0   ;;  %s1731_s12 = smov 0  }
  0x13   :  { %s1733_s13 = smov 0   ;;  %s1735_s14 = smov 0  }
  0x14   :  { %s1737_s15 = smov 0  }
  0x15 LB: > { %2214 = sst [smem:[#allocation18_spill]] %s1646_s11  ;;  %s38_s16 = sadd.s32 1, %s1654_s13  ;;  %s1662_s15 = sphi %s1737_s15, %s29_s15   ;;  %s1658_s14 = sphi %s1735_s14, %s2253_s14   ;;  %s1654_s13 = sphi %s1733_s13, %s2252_s13   ;;  %s1650_s12 = sphi %s1731_s12, %s2251_s12   ;;  %s1646_s11 = sphi %s1729_s11, %s2250_s11   ;;  %s1642_s10 = sphi %s1727_s10, %s2259_s10   ;;  %s1638_s9 = sphi %s1725_s9, %s2258_s9   ;;  %s1634_s30 = sphi %s1723_s30, %s2257_s30   ;;  %s1630_s29 = sphi %s1721_s29, %s2256_s29   ;;  %s1626_s28 = sphi %s1719_s28, %s2255_s28   ;;  %s1622_s27 = sphi %s1717_s27, %s2254_s27  }
  0x16   : > { %2215 = sst [smem:[#allocation19_spill]] %s1654_s13  ;;  %s41_s17 = sadd.s32 1, %s1658_s14 }
  0x17   : > { %2216 = sst [smem:[#allocation20_spill]] %s1658_s14  ;;  %p39_p0 = scmp.ge.s32.totalorder %s38_s16, 2 }
  0x18   : > { %s1206_s18 = sshll.u32 %s1658_s14, 1  ;;  %p80_p1 = scmp.ne.s32.totalorder %s1642_s10, %s1638_s9 }
  0x19   : > { %s1776_s19 = sadd.s32 %s1654_s13, %s1206_s18  ;;  %s2261_s16 = smov (%p39_p0, %s38_s16), 0 }
  0x1a   : > { %2217 = sst [smem:[#allocation21_spill]] %s2261_s16  ;;  %s2263_s17 = smov (!%p39_p0, %s41_s17), %s1658_s14 }
  0x1b   : > { %p81_p2 = scmp.eq.s32.totalorder %s1662_s15, 0  ;;  %p43_p3 = scmp.ge.s32.totalorder %s2263_s17, 2 }
  0x1c   : > { %s73_s20 = sadd.s32 1, %s1642_s10  ;;  %p1291_p5 = scmp.lt.s32.totalorder %s1662_s15, 4 }
  0x1d   : > { %p1785_p4 = por %p81_p2, %p80_p1  ;;  %s2265_s17 = smov (%p43_p3, %s2263_s17), 0 }
  0x1e   : > { %2219 = sst [smem:[#allocation22_spill]] %s2265_s17  ;;  %s307_s22 = sand.u32 1, %s1662_s15  }
  0x1f   : > { %s1207_s23 = sshll.u32 %s2265_s17, 1  ;;  %s309_s24 = sand.u32 1, %s1642_s10  }
  0x20   : > { %s69_s25 = sadd.s32 %s1207_s23, %s2261_s16  ;;  %s126_s26 = ssub.s32 %s1658_s14, %s2265_s17 }
  0x21   : > { %s70_s18 = ssub.s32 %s1776_s19, %s69_s25  ;;  %s1799_s13 = sshll.u32 %s309_s24, 3 }
  0x22   : > { %p71_p6 = scmp.eq.s32.totalorder %s70_s18, 0  ;;  %s2196_s5 = sshll.u32 %s1776_s19, 7 }
  0x23   : > { %s2221_s1 = sld [smem:[#allocation25_spill]]  ;;  %s311_s23 = scalar_lea.vmem [#allocation7], %s1799_s13 }
  0x24   : > { %s1803_s3 = scalar_select %p71_p6, %s1642_s10, %s73_s20  }
  0x25   : > { %s321_s17 = sshll.u32 %s311_s23, 4  ;;  %p1819_p7 = pnand %p1291_p5, %p1785_p4  ;;  %s1813_s17 = int_to_ptr.vmem [resolvable:$true] %s321_s17 }
  0x26   : > { %2220 = sst [smem:[#allocation23_spill]] %s1803_s3  ;;  %p1823_p8 = scmp.eq.s32.totalorder %s126_s26, 0 }
  0x27   : > { %s1827_s11 = scalar_lea.sflag [#allocation8], %s307_s22  ;;  %p1390_p10 = pneg %p1819_p7 }
  0x29   : > { %s1810_s7 = scalar_lea.hbm %s2221_s1, %s2196_s5  ;;  %s1393_s18 = scalar_lea.hbm %s2221_s1, 512 }
  0x2a   : > { %s1388_s20 = scalar_lea.hbm %s1810_s7, 128  ;;  %p1394_p13 = scmp.lt.u32.totalorder %s1810_s7, %s2221_s1 }
  0x2b   : > { %p1389_p9 = scmp.ne.s32.totalorder %s1810_s7, %s1388_s20  ;;  %p1395_p0 = scmp.lt.u32.totalorder %s1393_s18, %s1388_s20 }
  0x2c   : > { %p1397_p2 = scmp.lt.u32.totalorder %s1388_s20, %s1810_s7 }
  0x2d   : > { %p1391_p11 = pnand %p1390_p10, %p1389_p9  ;;  %p1396_p1 = por %p1395_p0, %p1394_p13 }
  0x2f   : > { %p1392_p12 = pneg %p1391_p11  ;;  %p1398_p3 = por %p1397_p2, %p1396_p1 }
  0x31   : > { %p1399_p4 = pnand %p1398_p3, %p1392_p12 }
  0x33   : > { %1402 = shalt.err (!%p1399_p4)
}
  0x34   : > { %s1403_s22 = scalar_lea.vmem %s1813_s17, 128  ;;  %s1664_s26 = smov [#allocation7]  }
  0x35   : > { %p1404_p5 = scmp.ne.s32.totalorder %s1813_s17, %s1403_s22  ;;  %s1408_s21 = sshll.u32 %s1664_s26, 4  ;;  %s1409_s21 = int_to_ptr.vmem [resolvable:$false] %s1408_s21 }
  0x36   : > { %s1410_s5 = scalar_lea.vmem %s1409_s21, 256  ;;  %p1411_p11 = scmp.lt.s32.totalorder %s1813_s17, %s1409_s21 }
  0x37   : > { %p1406_p6 = pnand %p1404_p5, %p1390_p10  ;;  %p1412_p13 = scmp.lt.s32.totalorder %s1410_s5, %s1403_s22 }
  0x39   : > { %p1407_p9 = pneg %p1406_p6  ;;  %p1413_p0 = por %p1412_p13, %p1411_p11 }
  0x3b   : > { %p1414_p1 = pnand %p1413_p0, %p1407_p9 }
  0x3d   : > { %1417 = shalt.err (!%p1414_p1)
}
  0x3e   : > { %1276 = dma.hbm_to_vmem [thread:$0]  (!%p1819_p7), %s1810_s7, 128, %s1813_s17, %s1827_s11  }
  0x3f   : > { %s1856_s20 = sadd.s32 4294967295, %s1662_s15   ;;  %s2197_s25 = sadd.s32 4294967294, %s1662_s15  }
  0x40   : > { %p86_p12 = scmp.ne.s32.totalorder %s1638_s9, %s1634_s30  ;;  %p2199_p2 = scmp.eq.s32.totalorder %s1856_s20, 0 }
  0x41   : > { %s129_s18 = sadd.s32 1, %s1630_s29  ;;  %p139_p4 = scmp.ne.s32.totalorder %s1630_s29, %s1626_s28 }
  0x42   : > { %s1866_s23 = scalar_select %p1823_p8, %s1630_s29, %s129_s18  }
  0x43   : > { %p1870_p3 = por %p2199_p2, %p86_p12  ;;  %p140_p5 = scmp.eq.s32.totalorder %s1856_s20, 3 }
  0x44   : > { %p145_p6 = scmp.ne.s32.totalorder %s1626_s28, %s1622_s27  ;;  %p146_p9 = scmp.eq.s32.totalorder %s2197_s25, 3 }
  0x45   : > { %s2224_s22 = scalar_select %p1870_p3, 1, 0 }
  0x46   : > { %p1210_p11 = scmp.ge.s32.totalorder %s1662_s15, 1  ;;  %p1882_p13 = por %p140_p5, %p139_p4 }
  0x47   : > { %p283_p0 = scmp.lt.s32.totalorder %s1662_s15, 5  ;;  %p1887_p8 = por %p146_p9, %p145_p6 }
  0x48   : > { %s2225_s7 = scalar_select %p1882_p13, 1, 0 }
  0x49   : > { %s2226_s30 = scalar_select %p1887_p8, 1, 0 }
  0x4a   : > { %p1891_p1 = pnand %p1210_p11, %p283_p0  ;;  %s1665_s4 = smov [#allocation4]  }
  0x4b   : > { %s296_s26 = sshll.u32 %s1665_s4, 4  ;;  %s332_s21 = scalar_lea.vmem [#allocation9], %s1799_s13  ;;  %s1907_s26 = int_to_ptr.vmem [resolvable:$true] %s296_s26 }
  0x4c   : > { %s2227_s17 = scalar_select %p1891_p1, 1, 0 }
  0x4d   : > { %s342_s5 = sshll.u32 %s332_s21, 4  ;;  %s2228_s18 = sshll.u32 %s1776_s19, 7  ;;  %s1905_s5 = int_to_ptr.vmem [resolvable:$true] %s342_s5 }
  0x4e   : > { %s2229_s2 = sld [smem:[#allocation26_spill]]  ;;  %p1269_p12 = pneg %p1891_p1 }
  0x50   : > { %p1911_p4 = pnand %p1269_p12, %p2199_p2 }
  0x54   : > { %s1901_s16 = scalar_lea.hbm %s2229_s2, %s2228_s18  ;;  %s1423_s4 = scalar_lea.hbm %s2229_s2, 512 }
  0x55   : > { %s1418_s19 = scalar_lea.hbm %s1901_s16, 128  ;;  %p1424_p11 = scmp.lt.u32.totalorder %s1901_s16, %s2229_s2 }
  0x56   : > { %p1419_p5 = scmp.ne.s32.totalorder %s1901_s16, %s1418_s19  ;;  %p1425_p0 = scmp.lt.u32.totalorder %s1423_s4, %s1418_s19 }
  0x57   : > { %p1427_p12 = scmp.lt.u32.totalorder %s1418_s19, %s1901_s16 }
  0x58   : > { %p1421_p6 = pnand %p1419_p5, %p1390_p10  ;;  %p1426_p8 = por %p1425_p0, %p1424_p11 }
  0x5a   : > { %p1422_p9 = pneg %p1421_p6  ;;  %p1428_p2 = por %p1427_p12, %p1426_p8 }
  0x5c   : > { %p1429_p13 = pnand %p1428_p2, %p1422_p9 }
  0x5e   : > { %1432 = shalt.err (!%p1429_p13)
}
  0x5f   : > { %s1433_s14 = scalar_lea.vmem %s1905_s5, 128  ;;  %s1666_s1 = smov [#allocation9]  }
  0x60   : > { %p1434_p5 = scmp.ne.s32.totalorder %s1905_s5, %s1433_s14  ;;  %s1438_s25 = sshll.u32 %s1666_s1, 4  ;;  %s1439_s25 = int_to_ptr.vmem [resolvable:$false] %s1438_s25 }
  0x61   : > { %s1440_s21 = scalar_lea.vmem %s1439_s25, 256  ;;  %p1441_p1 = scmp.lt.s32.totalorder %s1905_s5, %s1439_s25 }
  0x62   : > { %p1436_p6 = pnand %p1434_p5, %p1390_p10  ;;  %p1442_p11 = scmp.lt.s32.totalorder %s1440_s21, %s1433_s14 }
  0x64   : > { %p1437_p3 = pneg %p1436_p6  ;;  %p1443_p0 = por %p1442_p11, %p1441_p1 }
  0x66   : > { %p1444_p8 = pnand %p1443_p0, %p1437_p3 }
  0x68   : > { %1447 = shalt.err (!%p1444_p8)
}
  0x69   : > { %1279 = dma.hbm_to_vmem [thread:$0]  (!%p1819_p7), %s1901_s16, 128, %s1905_s5, %s1827_s11  }
  0x6a   : > { %s2231_s0 = sld [smem:[#allocation24_spill]]  ;;  %p1450_p2 = pneg %p1911_p4 }
  0x70   : > { %s1448_s18 = scalar_lea.hbm %s2231_s0, 16 }
  0x71   : > { %p1449_p10 = scmp.ne.s32.totalorder %s2231_s0, %s1448_s18  ;;  %p1455_p1 = scmp.lt.u32.totalorder %s1448_s18, %s2231_s0 }
  0x73   : > { %p1451_p13 = pnand %p1450_p2, %p1449_p10 }
  0x75   : > { %p1452_p3 = pneg %p1451_p13 }
  0x77   : > { %p1457_p9 = pnand %p1455_p1, %p1452_p3 }
  0x79   : > { %1460 = shalt.err (!%p1457_p9)
}
  0x7a   : > { %s1461_s16 = scalar_lea.vmem %s1907_s26, 16  ;;  %s1468_s2 = scalar_lea.vmem %s1907_s26, 32 }
  0x7b   : > { %p1462_p7 = scmp.ne.s32.totalorder %s1907_s26, %s1461_s16  ;;  %p1469_p6 = scmp.lt.s32.totalorder %s1907_s26, %s1907_s26 }
  0x7c   : > { %p1470_p11 = scmp.lt.s32.totalorder %s1468_s2, %s1461_s16 }
  0x7d   : > { %p1464_p12 = pnand %p1462_p7, %p1450_p2 }
  0x7e   : > { %p1471_p0 = por %p1470_p11, %p1469_p6 }
  0x7f   : > { %p1465_p5 = pneg %p1464_p12 }
  0x81   : > { %p1472_p8 = pnand %p1471_p0, %p1465_p5 }
  0x83   : > { %1475 = shalt.err (!%p1472_p8)
}
  0x84   : > { %1272 = dma.hbm_to_vmem [thread:$0]  (!%p1911_p4), %s2231_s0, 16, %s1907_s26, [#allocation5]  }
  0x85   : > { %p2232_p10 = scmp.ne.s32.totalorder %s2227_s17, 0 }
  0x86   : > { %p2233_p2 = scmp.eq.s32.totalorder (!%p2232_p10), %s1856_s20, 0 }
  0x87   : > { %351 = sbr.rel (%p2232_p10) target bundleno = 845 (0x34d), region = 32 }
  0x8e   : > { %1605 = dma.done.wait (%p2233_p2), [#allocation5], 16   ;;  %p2234_p13 = pmov %p2233_p2 }
  0x8f   : > { %s2204_s5 = sand.u32 1, %s1856_s20   ;;  %s359_s13 = sand.u32 1, %s1638_s9  }
  0x90   : > { %1607 = vsyncadd (%p2234_p13), [#allocation5], 4294967280  ;;  %s1969_s21 = sshll.u32 %s359_s13, 3  ;;  %s358_s26 = scalar_lea.sflag [#allocation8], %s2204_s5 }
  0x91   : > { %p2235_p4 = scmp.ne.s32.totalorder %s2224_s22, 0 }
  0x93   : > { %1609 = dma.done.wait (%p2235_p4), %s358_s26, 256  }
  0x94   : > { %1611 = vsyncadd (%p2235_p4), %s358_s26, 4294967040  ;;  %s2205_s17 = sand.u32 1, %s1626_s28   ;;  %p435_p3 = scmp.lt.s32.totalorder %s1650_s12, 1 }
  0x95   : > { %s1225_s4 = sshll.u32 %s2205_s17, 2  ;;  %s2236_s6 = sld [smem:[#allocation30_spill]] }
  0x96   : > { %s436_s18 = scalar_select %p435_p3, %s1650_s12, 1 }
  0x97   : > { %s2237_s26 = sld [smem:[#allocation31_spill]]  ;;  %s370_s19 = scalar_lea.vmem [#allocation9], %s1969_s21 }
  0x98   : > { %s1228_s1 = sshll.u32 %s436_s18, 2  ;;  %s1986_s16 = scalar_lea.vmem %s2190_s8, %s436_s18 }
  0x99   : > { %s1999_s17 = scalar_lea.vmem [#allocation10], %s1225_s4  ;;  %s2001_s0 = scalar_lea.vmem [#allocation11], %s1225_s4 }
  0x9a   : > { %s2003_s3 = scalar_lea.vmem [#allocation13], %s1225_s4  ;;  %s2238_s14 = sld [smem:[#allocation18_spill]] }
  0x9b   : > { %s1991_s22 = scalar_lea.vmem %s2236_s6, %s1228_s1 }
  0x9d   : > { %s1996_s5 = scalar_lea.vmem %s2237_s26, %s1228_s1 }
  0xa0   : > { %p1230_p1 = scmp.ne.s32.totalorder %s2238_s14, 0 }
  0xa1   : > { %v452_v0 = vlaneseq (!%p1230_p1)  ;;  %v1231_v1 = vld [vmem:[#allocation4] ss:$0 sm:$0xff] (!%p1230_p1)  ;;  %vm471_vm0 = vcmask (!%p1230_p1), 27648   ;;  %vm477_vm1 = vcmask (!%p1230_p1), 0   ;;  %v1667_v3 = vmov (!%p1230_p1), 0.0  }
  0xa2   : > { %450 = sbr.rel (%p1230_p1) target bundleno = 322 (0x142), region = 48  ;;  %472 = vst.msk [vmem:[%s1999_s17] sm:$0xf] (!%p1230_p1), %vm471_vm0, %v1667_v3  ;;  %473 = vst.msk [vmem:[%s2001_s0] sm:$0xf] (!%p1230_p1), %vm471_vm0, %v1667_v3  ;;  %vm464_vm2 = vcmask (!%p1230_p1), 60416  }
  0xa3   : > { %v453_v2 = vshrl.u32 (!%p1230_p1), %v452_v0, 7  ;;  %474 = vst.msk [vmem:[%s2003_s3] sm:$0xf] (!%p1230_p1), %vm471_vm0, %v1667_v3  ;;  %vm462_vm4 = vcmask (!%p1230_p1), 58368   ;;  %vm469_vm5 = vcmask (!%p1230_p1), 3072  }
  0xa4   : > { %478 = vst.msk [vmem:[%s1986_s16] sm:$0x1] (!%p1230_p1), %vm477_vm1, %v1667_v3 }
  0xa5   : > { %vm458_vm3 = vcmp.eq.s32.totalorder (!%p1230_p1), %v453_v2, %v1231_v1  ;;  %475 = vst.msk [vmem:[%s1991_s22] sm:$0xf] (!%p1230_p1), %vm469_vm5, %v1667_v3  ;;  %476 = vst.msk [vmem:[%s1996_s5] sm:$0xf] (!%p1230_p1), %vm469_vm5, %v1667_v3 }
  0xa6   : > { %v1232_v4 = vsel (!%p1230_p1), %vm458_vm3, 1.0, %v1667_v3 }
  0xa7   : > { %v461_v5 = vpack.c.bf16 (!%p1230_p1), %v1232_v4, %v1232_v4  ;;  %v465_v6 = vsel (!%p1230_p1), %vm464_vm2, %v1232_v4, 0.0 }
  0xa8   : > { %466 = vadd.xlane.f32.xlu0 (!%p1230_p1), %v465_v6 }
  0xa9   : > { %463 = vst.msk [vmem:[#allocation2] sm:$0x3] %vm462_vm4, %v461_v5 }
 0x135   : > { %v467_v7 = vpop.xlane.xlu0 %466 }
 0x136   : > { %1385 = vrcp.f32 %v467_v7 }
 0x140   : > { %v1386_v8 = vpop.eup %1385 }
 0x141   : > { %470 = vst.msk [vmem:[#allocation3] sm:$0xf] %vm469_vm5, %v1386_v8 }
 0x142 PF: > { %s2239_s4 = sld [smem:[#allocation18_spill]]  ;;  %s1233_s18 = sshll.u32 %s1650_s12, 1  ;;  %v483_v9 = vlaneseq  ;;  %v1668_v10 = vmov 0   ;;  %v490_v16 = vld [vmem:[%s370_s19] sm:$0xff]  ;;  %vm505_vm9 = vcmask 1043456   ;;  %vm501_vm10 = vcmask 64512  }
 0x143   : > { %544 = vmatprep.mubr.bf16.mxu0 %v1668_v10  ;;  %603 = vmatprep.mubr.bf16.mxu1 %v1668_v10  ;;  %s2240_s24 = scalar_lea.vmem [#allocation7], %s1969_s21  ;;  %vm872_vm11 = vcmask 1040384   ;;  %vm857_vm12 = vcmask 3072   ;;  %s1246_s21 = sshll.u32 %s1650_s12, 6  ;;  %vm686_vm13 = vcmask 27648  }
 0x144   : > { %v484_v12 = vand.u32 127, %v483_v9  ;;  %1387 = vset.pattern.permute.xlu0 %v1668_v10  ;;  %v489_v15 = vld [vmem:[%s2240_s24] sm:$0xff]  ;;  %s937_s19 = sshll.u32 %s2001_s0, 4  ;;  %s2241_s26 = sld [smem:[#allocation28_spill]]  ;;  %s2043_s19 = int_to_ptr.vmem [resolvable:$true] %s937_s19 }
 0x145   : > { %v850_v4 = vld [vmem:[%s1991_s22] sm:$0xf]  ;;  %s950_s14 = sshll.u32 %s2003_s3, 4  ;;  %s2243_s24 = sld [smem:[#allocation29_spill]]  ;;  %s2062_s14 = int_to_ptr.vmem [resolvable:$true] %s950_s14 }
 0x146   : > { %v485_v13 = vadd.s32 128, %v484_v12  ;;  %v859_v7 = vld [vmem:[%s1996_s5] sm:$0xf]  ;;  %s2244_s13 = sand.u32 1, %s1856_s20   ;;  %s1476_s12 = scalar_lea.vmem %s2043_s19, 64 }
 0x147   : > { %s2066_s6 = scalar_lea.sflag [#allocation12], %s2244_s13  ;;  %p1477_p9 = scmp.ne.s32.totalorder %s2043_s19, %s1476_s12 }
 0x148   : > { %s480_s1 = sadd.s32 %s2239_s4, %s1233_s18  ;;  %v495_v11 = vld [vmem:[#allocation3] sm:$0xf]  ;;  %s2242_s18 = sld [smem:[#allocation27_spill]] }
 0x149   : > { %s1234_s25 = sshll.u32 %s480_s1, 8  ;;  %555 = vperm.xlu0 %1387, %v495_v11   ;;  %v494_v25 = vld [vmem:[#allocation2] sm:$0x3]  ;;  %p2245_p7 = scmp.ne.s32.totalorder %s2225_s7, 0 }
 0x14a   : > { %s482_s2 = ssub.s32 960, %s1234_s25  ;;  %s1669_s4 = smov [#allocation11]  }
 0x14b   : > { %v486_v14 = vstv %s482_s2  ;;  %s2060_s11 = scalar_lea.hbm %s2243_s24, %s1246_s21  ;;  %p1478_p12 = pnand %p1477_p9, %p2245_p7 }
 0x14c   : > { %vm487_vm6 = vcmp.lt.s32.totalorder %v484_v12, %v486_v14  ;;  %vm488_vm7 = vcmp.lt.s32.totalorder %v485_v13, %v486_v14 }
 0x14d   : > { %vm491_vm8 = vmpackc.low %vm488_vm7, %vm487_vm6  ;;  %p1479_p5 = pneg %p1478_p12 }
 0x14e   : > { %v492_v17 = vsel %vm491_vm8, %v489_v15, 0  ;;  %v493_v18 = vsel %vm491_vm8, %v490_v16, 0  ;;  %s2049_s1 = scalar_lea.hbm %s2242_s18, %s1246_s21 }
 0x14f   : > { %v1236_v19 = vcombine.high %v492_v17, %v492_v17  ;;  %v1240_v20 = vcombine.high %v493_v18, %v493_v18  ;;  %v1235_v21 = vcombine.low %v492_v17, %v492_v17  ;;  %v1239_v22 = vcombine.low %v493_v18, %v493_v18  ;;  %v614_v17 = vld [vmem:[%s1999_s17] sm:$0xf]  ;;  %v688_v18 = vld [vmem:[%s2001_s0] sm:$0xf] }
 0x151   : > { %1237 = vmatprep.subr.msk.bf16.mxu0 %vm505_vm9, %v1236_v19  ;;  %1241 = vmatprep.subr.msk.bf16.mxu1 %vm505_vm9, %v1240_v20  ;;  %v507_v23 = vsel %vm505_vm9, %v1235_v21, 0  ;;  %v566_v24 = vsel %vm505_vm9, %v1239_v22, 0 }
 0x152   : > { %513 = vmatpush1.bf16.msra.mxu0 %v507_v23  ;;  %572 = vmatpush1.bf16.msra.mxu1 %v566_v24 }
 0x155   : > { %1238 = vmatmul.mubr.msk.bf16.vlgmr.msra.gmra.mrb[0].mxu0 %vm501_vm10, %v494_v25  ;;  %1242 = vmatmul.mubr.msk.bf16.vlgmr.msra.gmra.mrb[0].mxu1 %vm501_vm10, %v494_v25  ;;  %v761_v25 = vld [vmem:[%s2003_s3] sm:$0xf] }
 0x1c8   : > { %v556_v26 = vpop.permute.xlu0 %555 }
 0x228   : > { %v546_v27 = vpop.f32.mrb[0].mxu0  ;;  %v605_v28 = vpop.f32.mrb[0].mxu1 }
 0x229   : > { %v558_v29 = vmul.f32 %v556_v26, %v546_v27  ;;  %v548_v30 = vpop.f32.mrb[1].mxu0  ;;  %v607_v31 = vpop.f32.mrb[1].mxu1  ;;  %v612_v32 = vmul.f32 %v605_v28, %v556_v26 }
 0x22a   : > { %v559_v33 = vmul.f32 %v556_v26, %v548_v30  ;;  %v613_v34 = vmul.f32 %v607_v31, %v556_v26  ;;  %v550_v35 = vpop.f32.mrb[2].mxu0  ;;  %v609_v36 = vpop.f32.mrb[2].mxu1 }
 0x22b   : > { %v551_v37 = vpop.f32.mrb[3].mxu0  ;;  %v610_v38 = vpop.f32.mrb[3].mxu1  ;;  %v851_v39 = vsel %vm505_vm9, %v558_v29, 0.0  ;;  %v834_v40 = vmul.f32 %v558_v29, %v558_v29 }
 0x22c   : > { %615 = vmatprep.subr.mxu0 %v559_v33  ;;  %679 = vmatprep.mubr.f32.mxu0 %v559_v33  ;;  %v852_v41 = vsel %vm505_vm9, %v559_v33, 0.0  ;;  %v835_v42 = vmul.f32 %v559_v33, %v559_v33 }
 0x22d   : > { %689 = vmatprep.subr.mxu1 %v613_v34  ;;  %753 = vmatprep.mubr.f32.mxu1 %v613_v34  ;;  %v853_v43 = vadd.f32 %v852_v41, %v851_v39  ;;  %v836_v44 = vsel %vm505_vm9, %v834_v40, 0.0 }
 0x22e   : > { %616 = vmatpush1.xpose.msra.mxu0 %v558_v29  ;;  %690 = vmatpush1.xpose.msra.mxu1 %v612_v32  ;;  %v837_v45 = vrot.slane %v836_v44, 4  ;;  %v843_v46 = vsel %vm505_vm9, %v835_v42, 0.0 }
 0x22f   : > { %762 = vmatprep.subr.mxu0 %v613_v34  ;;  %854 = vadd.xlane.f32.xlu1 %v853_v43  ;;  %v844_v47 = vrot.slane %v843_v46, 4 }
 0x230   : > { %v838_v48 = vadd.f32 %v837_v45, %v836_v44 }
 0x231   : > { %680 = vmatmul.mubr.f32.vlgmr.msra.gmra.mrb[4].mxu0 %v558_v29  ;;  %754 = vmatmul.mubr.f32.vlgmr.msra.gmra.mrb[4].mxu1 %v612_v32  ;;  %v845_v49 = vadd.f32 %v844_v47, %v843_v46 }
 0x232   : > { %763 = vmatpush1.xpose.msra.mxu0 %v612_v32  ;;  %826 = vmatprep.mubr.f32.mxu0 %v559_v33  ;;  %v839_v50 = vrot.slane %v838_v48, 2 }
 0x233   : > { %v846_v51 = vrot.slane %v845_v49, 2 }
 0x234   : > { %v840_v52 = vadd.f32 %v839_v50, %v838_v48 }
 0x235   : > { %827 = vmatmul.mubr.f32.vlgmr.msra.gmra.mrb[6].mxu0 %v558_v29  ;;  %v847_v53 = vadd.f32 %v846_v51, %v845_v49 }
 0x236   : > { %v841_v54 = vrot.slane %v840_v52, 1 }
 0x237   : > { %v848_v55 = vrot.slane %v847_v53, 1 }
 0x238   : > { %v842_v56 = vadd.f32 %v841_v54, %v840_v52 }
 0x239   : > { %v849_v57 = vadd.f32 %v848_v55, %v847_v53 }
 0x23a   : > { %v870_v58 = vmul.f32 %v842_v56, %v842_v56  ;;  %v860_v59 = vmul.f32 %v842_v56, %v558_v29 }
 0x23b   : > { %v871_v60 = vmul.f32 %v849_v57, %v849_v57  ;;  %v861_v61 = vmul.f32 %v849_v57, %v559_v33 }
 0x23c   : > { %v873_v62 = vsel %vm872_vm11, %v870_v58, 0.0  ;;  %v862_v63 = vsel %vm505_vm9, %v860_v59, 0.0 }
 0x23d   : > { %v874_v0 = vsel %vm872_vm11, %v871_v60, 0.0  ;;  %v863_v1 = vsel %vm505_vm9, %v861_v61, 0.0 }
 0x23e   : > { %v875_v2 = vadd.f32 %v874_v0, %v873_v62  ;;  %v864_v3 = vadd.f32 %v863_v1, %v862_v63 }
 0x240   : > { %876 = vadd.xlane.f32.xlu0 %v875_v2  ;;  %865 = vadd.xlane.f32.xlu1 %v864_v3 }
 0x2bc   : > { %v855_v5 = vpop.xlane.xlu1 %854 }
 0x2bd   : > { %v856_v6 = vadd.f32 %v855_v5, %v850_v4 }
 0x2bf   : > { %858 = vst.msk [vmem:[%s1991_s22] sm:$0xf] %vm857_vm12, %v856_v6  ;;  %s924_s22 = sshll.u32 %s1999_s17, 4  ;;  %s2051_s22 = int_to_ptr.vmem [resolvable:$true] %s924_s22 }
 0x2cd   : > { %v877_v8 = vpop.xlane.xlu0 %876  ;;  %v866_v9 = vpop.xlane.xlu1 %865 }
 0x2ce   : > { %v878_v10 = vrot.slane %v877_v8, 4  ;;  %v867_v11 = vadd.f32 %v866_v9, %v859_v7 }
 0x2d0   : > { %v879_v12 = vadd.f32 %v878_v10, %v877_v8  ;;  %868 = vst.msk [vmem:[%s1996_s5] sm:$0xf] %vm857_vm12, %v867_v11  ;;  %s2040_s5 = scalar_lea.hbm %s2241_s26, %s1246_s21 }
 0x2d2   : > { %v880_v13 = vrot.slane %v879_v12, 2 }
 0x2d4   : > { %v881_v14 = vadd.f32 %v880_v13, %v879_v12 }
 0x2d6   : > { %v882_v15 = vrot.slane %v881_v14, 1 }
 0x2d8   : > { %v883_v16 = vadd.f32 %v882_v15, %v881_v14 }
 0x2da   : > { %1253 = vpush %v883_v16 }
 0x304   : > { %v681_v19 = vpop.f32.mrb[4].mxu0  ;;  %v755_v20 = vpop.f32.mrb[4].mxu1 }
 0x305   : > { %v685_v21 = vadd.f32 %v681_v19, %v614_v17  ;;  %v759_v22 = vadd.f32 %v755_v20, %v688_v18  ;;  %v683_v23 = vpop.f32.mrb[5].mxu0  ;;  %v757_v24 = vpop.f32.mrb[5].mxu1 }
 0x307   : > { %687 = vst.msk [vmem:[%s1999_s17] sm:$0xf] %vm686_vm13, %v685_v21  ;;  %760 = vst.msk [vmem:[%s2001_s0] sm:$0xf] %vm686_vm13, %v759_v22  ;;  %s1480_s17 = sshll.u32 %s1669_s4, 4  ;;  %s1481_s17 = int_to_ptr.vmem [resolvable:$false] %s1480_s17 }
 0x308   : > { %v828_v26 = vpop.f32.mrb[6].mxu0  ;;  %s1482_s0 = scalar_lea.vmem %s1481_s17, 128  ;;  %p1483_p6 = scmp.lt.s32.totalorder %s2043_s19, %s1481_s17 }
 0x309   : > { %p1484_p11 = scmp.lt.s32.totalorder %s1482_s0, %s1476_s12 }
 0x30b   : > { %p1485_p0 = por %p1484_p11, %p1483_p6 }
 0x30d   : > { %p1486_p8 = pnand %p1485_p0, %p1479_p5 }
 0x30f   : > { %1489 = shalt.err (!%p1486_p8)
}
 0x310   : > { %s1490_s20 = scalar_lea.hbm %s2040_s5, 64  ;;  %s1494_s2 = scalar_lea.hbm %s2241_s26, 128 }
 0x311   : > { %p1491_p10 = scmp.ne.s32.totalorder %s2040_s5, %s1490_s20  ;;  %p1495_p4 = scmp.lt.u32.totalorder %s2040_s5, %s2241_s26 }
 0x312   : > { %p1496_p3 = scmp.lt.u32.totalorder %s1494_s2, %s1490_s20  ;;  %p1498_p9 = scmp.lt.u32.totalorder %s1490_s20, %s2040_s5 }
 0x313   : > { %p1492_p2 = pnand %p1491_p10, %p2245_p7 }
 0x314   : > { %p1497_p1 = por %p1496_p3, %p1495_p4 }
 0x315   : > { %p1493_p13 = pneg %p1492_p2 }
 0x316   : > { %p1499_p12 = por %p1498_p9, %p1497_p1 }
 0x318   : > { %p1500_p5 = pnand %p1499_p12, %p1493_p13 }
 0x31a   : > { %1503 = shalt.err (!%p1500_p5)
}
 0x31b   : > { %1264 = dma.vmem_to_hbm [thread:$0]  (%p2245_p7), %s2043_s19, 64, %s2040_s5, %s2066_s6   ;;  %v832_v27 = vadd.f32 %v828_v26, %v761_v25  ;;  %v830_v28 = vpop.f32.mrb[7].mxu0 }
 0x31c   : > { %s2246_s12 = sand.u32 1, %s1626_s28   ;;  %s1504_s0 = scalar_lea.vmem %s2051_s22, 64 }
 0x31d   : > { %s890_s17 = scalar_lea.sflag [#allocation6], %s2246_s12  ;;  %p1505_p6 = scmp.ne.s32.totalorder %s2051_s22, %s1504_s0 }
 0x31e   : > { %s1670_s20 = smov [#allocation10]  }
 0x31f   : > { %p1506_p11 = pnand %p1505_p6, %p2245_p7  ;;  %s1508_s21 = sshll.u32 %s1670_s20, 4  ;;  %s1509_s21 = int_to_ptr.vmem [resolvable:$false] %s1508_s21 }
 0x320   : > { %s1510_s25 = scalar_lea.vmem %s1509_s21, 128  ;;  %p1511_p8 = scmp.lt.s32.totalorder %s2051_s22, %s1509_s21 }
 0x321   : > { %p1507_p0 = pneg %p1506_p11  ;;  %p1512_p10 = scmp.lt.s32.totalorder %s1510_s25, %s1504_s0 }
 0x323   : > { %p1513_p2 = por %p1512_p10, %p1511_p8 }
 0x325   : > { %p1514_p13 = pnand %p1513_p2, %p1507_p0 }
 0x327   : > { %1517 = shalt.err (!%p1514_p13)
}
 0x328   : > { %s1518_s19 = scalar_lea.hbm %s2049_s1, 64  ;;  %s1522_s13 = scalar_lea.hbm %s2242_s18, 128 }
 0x329   : > { %p1519_p4 = scmp.ne.s32.totalorder %s2049_s1, %s1518_s19  ;;  %p1523_p9 = scmp.lt.u32.totalorder %s2049_s1, %s2242_s18 }
 0x32a   : > { %p1524_p12 = scmp.lt.u32.totalorder %s1522_s13, %s1518_s19  ;;  %p1526_p6 = scmp.lt.u32.totalorder %s1518_s19, %s2049_s1 }
 0x32b   : > { %p1520_p3 = pnand %p1519_p4, %p2245_p7 }
 0x32c   : > { %p1525_p5 = por %p1524_p12, %p1523_p9 }
 0x32d   : > { %p1521_p1 = pneg %p1520_p3 }
 0x32e   : > { %p1527_p11 = por %p1526_p6, %p1525_p5 }
 0x330   : > { %p1528_p0 = pnand %p1527_p11, %p1521_p1 }
 0x332   : > { %1531 = shalt.err (!%p1528_p0)
}
 0x333   : > { %1263 = dma.vmem_to_hbm [thread:$0]  (%p2245_p7), %s2051_s22, 64, %s2049_s1, %s890_s17   ;;  %v869_v29 = vld [vmem:[%s1986_s16] sm:$0x1]  ;;  %833 = vst.msk [vmem:[%s2003_s3] sm:$0xf] %vm686_vm13, %v832_v27  ;;  %vm887_vm14 = vcmask 0  }
 0x334   : > { %s2116_s0 = spop %1253  ;;  %s1532_s20 = scalar_lea.vmem %s2062_s14, 64 }
 0x335   : > { %v885_v30 = vstv %s2116_s0  ;;  %p1533_p8 = scmp.ne.s32.totalorder %s2062_s14, %s1532_s20  ;;  %s1671_s21 = smov [#allocation13]  }
 0x336   : > { %s1536_s25 = sshll.u32 %s1671_s21, 4  ;;  %s1537_s25 = int_to_ptr.vmem [resolvable:$false] %s1536_s25 }
 0x337   : > { %p1534_p10 = pnand %p1533_p8, %p2245_p7  ;;  %s1538_s19 = scalar_lea.vmem %s1537_s25, 128 }
 0x338   : > { %p1539_p13 = scmp.lt.s32.totalorder %s2062_s14, %s1537_s25  ;;  %p1540_p4 = scmp.lt.s32.totalorder %s1538_s19, %s1532_s20 }
 0x339   : > { %p1535_p2 = pneg %p1534_p10 }
 0x33a   : > { %p1541_p3 = por %p1540_p4, %p1539_p13 }
 0x33c   : > { %p1542_p1 = pnand %p1541_p3, %p1535_p2 }
 0x33e   : > { %1545 = shalt.err (!%p1542_p1)
}
 0x33f   : > { %s1546_s3 = scalar_lea.hbm %s2060_s11, 64  ;;  %s1550_s17 = scalar_lea.hbm %s2243_s24, 128 }
 0x340   : > { %p1547_p9 = scmp.ne.s32.totalorder %s2060_s11, %s1546_s3  ;;  %p1551_p6 = scmp.lt.u32.totalorder %s2060_s11, %s2243_s24 }
 0x341   : > { %p1552_p11 = scmp.lt.u32.totalorder %s1550_s17, %s1546_s3  ;;  %p1554_p8 = scmp.lt.u32.totalorder %s1546_s3, %s2060_s11 }
 0x342   : > { %p1548_p12 = pnand %p1547_p9, %p2245_p7 }
 0x343   : > { %p1553_p0 = por %p1552_p11, %p1551_p6 }
 0x344   : > { %p1549_p5 = pneg %p1548_p12 }
 0x345   : > { %p1555_p10 = por %p1554_p8, %p1553_p0 }
 0x347   : > { %p1556_p2 = pnand %p1555_p10, %p1549_p5 }
 0x349   : > { %1559 = shalt.err (!%p1556_p2)
}
 0x34a   : > { %1265 = dma.vmem_to_hbm [thread:$0]  (%p2245_p7), %s2062_s14, 64, %s2060_s11, %s2066_s6   ;;  %v886_v31 = vadd.f32 %v885_v30, %v869_v29 }
 0x34c   : > { %888 = vst.msk [vmem:[%s1986_s16] sm:$0x1] %vm887_vm14, %v886_v31 }
 0x34d PF: > { %p1293_p13 = scmp.ge.s32.totalorder %s1662_s15, 2  ;;  %s971_s13 = sand.u32 1, %s1622_s27  }
 0x34e   : > { %p2247_p4 = scmp.ne.s32.totalorder %s2226_s30, 0  ;;  %s972_s4 = scalar_lea.sflag [#allocation6], %s971_s13 }
 0x350   : > { %p1281_p3 = pnand %p1293_p13, %p2247_p4 }
 0x352   : > { %1613 = dma.done.wait (!%p1281_p3), %s972_s4, 64  }
 0x353   : > { %1615 = vsyncadd (!%p1281_p3), %s972_s4, 4294967232  ;;  %s2248_s7 = sadd.s32 4294967294, %s1662_s15  }
 0x354   : > { %s980_s12 = sand.u32 1, %s2248_s7  }
 0x355   : > { %s981_s0 = scalar_lea.sflag [#allocation12], %s980_s12 }
 0x356   : > { %1617 = dma.done.wait (!%p1281_p3), %s981_s0, 128  }
 0x357   : > { %1619 = vsyncadd (!%p1281_p3), %s981_s0, 4294967168  ;;  %s29_s15 = sadd.s32 1, %s1662_s15   ;;  %s2249_s6 = sld [smem:[#allocation23_spill]] }
 0x358   : > { %p26_p7 = scmp.ge.s32.totalorder %s29_s15, 6   ;;  %s2250_s11 = sld [smem:[#allocation19_spill]] }
 0x359   : > { %s2251_s12 = sld [smem:[#allocation20_spill]]  ;;  %s2252_s13 = sld [smem:[#allocation21_spill]] }
 0x35a   : > { %s2253_s14 = sld [smem:[#allocation22_spill]]  ;;  %s2254_s27 = smov %s1626_s28 }
 0x35b   : > { %s2255_s28 = smov %s1630_s29  ;;  %s2256_s29 = smov %s1866_s23 }
 0x35c   : > { %s2257_s30 = smov %s1638_s9  ;;  %s2258_s9 = smov %s1642_s10 }
 0x35d   : > { %s2259_s10 = smov %s2249_s6  ;;  %28 = sbr.rel (!%p26_p7) target bundleno = 21 (0x15), region = 165 }
 0x364   :  { %1015 = vsyncpa [#allocation5], 1 }
 0x365   :  { %1017 = vsyncpa [#allocation5 + $0x1], 1 }
 0x366   :  { %1018 = vsyncpa [#allocation8], 1 }
 0x367   :  { %1020 = vsyncpa [#allocation8 + $0x1], 1 }
 0x368   :  { %1021 = vsyncpa [#allocation6], 1 }
 0x369   :  { %1023 = vsyncpa [#allocation6 + $0x1], 1 }
 0x36a   :  { %1024 = vsyncpa [#allocation12], 1 }
 0x36b   :  { %1026 = vsyncpa [#allocation12 + $0x1], 1 }

</bundles_post_ra>
